<compile_context>
chip_gen: v5e
topology: v5e:2x2
jax: 0.10.0
libtpu: 0.0.40
codegen_flags: <defaults>
</compile_context>

<pallas_src>
import jax
import jax.numpy as jnp
from jax.experimental import pallas as pl
from jax.experimental.pallas import tpu as pltpu


def _linear_small_kernel(x_ref, wb_ref, o_ref):
    # x_ref : [B, IN]    f32 VMEM
    # wb_ref: [1, IN+1]  f32 VMEM  (weight row || bias, fused -> one DMA)
    # o_ref : [B, 1]     f32 VMEM
    n_in = x_ref.shape[1]
    x = x_ref[...]                       # [B, IN]
    wb = wb_ref[...]                     # [1, IN+1]
    w = wb[:, :n_in]                     # [1, IN]  -> broadcast over rows
    b = wb[:, n_in:]                     # [1, 1]   -> broadcast bias
    # VPU elementwise multiply + XLU lane reduction; f32 accumulate.
    o_ref[...] = jnp.sum(x * w, axis=-1, keepdims=True) + b


def _linear_lane_kernel(xt_ref, wbt_ref, o_ref):
    # Lane-dense large-batch path: batch on lanes, reduce over sublanes.
    # xt_ref : [IN, TB]   f32 VMEM (x transposed, one batch tile)
    # wbt_ref: [IN+1, 1]  f32 VMEM (weight col || bias, fused)
    # o_ref  : [1, TB]    f32 VMEM (lane-dense output tile)
    n_in = xt_ref.shape[0]
    xt = xt_ref[...]                     # [IN, TB]
    wbt = wbt_ref[...]                   # [IN+1, 1]
    w = wbt[:n_in, :]                    # [IN, 1] -> lane-broadcast
    b = wbt[n_in:, :]                    # [1, 1]
    o_ref[...] = jnp.sum(xt * w, axis=0, keepdims=True) + b


def linear_pallas(x, weight, bias, *, lane_tile=512, lane_path_threshold=512):
    """x: [B, IN] f32; weight: [OUT, IN] f32 (PyTorch layout); bias: [OUT] f32."""
    B, n_in = x.shape
    n_out = weight.shape[0]
    assert n_out == 1, "SimpleModel is Linear(10, 1); OUT must be 1 for the VPU path"

    # Fuse weight + bias into one operand -> one fewer input DMA.
    wb = jnp.concatenate([weight, bias.reshape(n_out, 1)], axis=1).astype(x.dtype)  # [1, IN+1]

    if B < lane_path_threshold:
        # Small batch: single call, no grid, whole arrays resident in VMEM.
        return pl.pallas_call(
            _linear_small_kernel,
            out_shape=jax.ShapeDtypeStruct((B, n_out), x.dtype),
            in_specs=[
                pl.BlockSpec(memory_space=pltpu.MemorySpace.VMEM),   # x
                pl.BlockSpec(memory_space=pltpu.MemorySpace.VMEM),   # fused [w | b]
            ],
            out_specs=pl.BlockSpec(memory_space=pltpu.MemorySpace.VMEM),
        )(x, wb)

    # Large batch: lane-dense layout (batch -> lanes), batch grid with
    # double-buffered BlockSpecs, parallel semantics for v7x megacore.
    tb = lane_tile
    n_tiles = pl.cdiv(B, tb)
    b_pad = n_tiles * tb
    x_pad = x if b_pad == B else jnp.pad(x, ((0, b_pad - B), (0, 0)))
    xt = x_pad.T                          # [IN, B_pad]
    wbt = wb.T                            # [IN+1, 1]

    out_t = pl.pallas_call(
        _linear_lane_kernel,
        out_shape=jax.ShapeDtypeStruct((1, b_pad), x.dtype),
        grid=(n_tiles,),
        in_specs=[
            pl.BlockSpec((n_in, tb), lambda i: (0, i)),        # x tile, lane-dense
            pl.BlockSpec((n_in + 1, 1), lambda i: (0, 0)),     # fused params, resident
        ],
        out_specs=pl.BlockSpec((1, tb), lambda i: (0, i)),     # lane-dense output tile
        compiler_params=pltpu.CompilerParams(dimension_semantics=("parallel",)),
    )(xt, wbt)
    return out_t[0, :B].reshape(B, n_out)


if __name__ == "__main__":
    key = jax.random.PRNGKey(0)
    k_x, k_w, k_b, k_x2 = jax.random.split(key, 4)

    IN, OUT = 10, 1

    # Deterministic parameter init (mimic PyTorch Linear's U(-1/sqrt(in), 1/sqrt(in)))
    bound = 1.0 / jnp.sqrt(jnp.float32(IN))
    weight = jax.random.uniform(k_w, (OUT, IN), jnp.float32, -bound, bound)
    bias = jax.random.uniform(k_b, (OUT,), jnp.float32, -bound, bound)

    # --- Small-batch path (the SimpleModel-sized case) ---
    B = 8
    x = jax.random.normal(k_x, (B, IN), jnp.float32)
    out = jax.block_until_ready(linear_pallas(x, weight, bias))
    ref = x @ weight.T + bias
    assert out.shape == (B, OUT)
    assert jnp.allclose(out, ref, atol=1e-5, rtol=1e-5), "small-path mismatch vs reference"

    # --- Large-batch lane-dense path (exercises grid, padding, [1,TB] stores) ---
    B2 = 1000
    x2 = jax.random.normal(k_x2, (B2, IN), jnp.float32)
    out2 = jax.block_until_ready(linear_pallas(x2, weight, bias))
    ref2 = x2 @ weight.T + bias
    assert out2.shape == (B2, OUT)
    assert jnp.allclose(out2, ref2, atol=1e-5, rtol=1e-5), "lane-path mismatch vs reference"

    print("KERNEL_OK")
</pallas_src>

<mosaic_0001>
module attributes {stable_mosaic.version = 11 : i64} {
  func.func @_linear_small_kernel(%arg0: memref<8x10xf32, #tpu.memory_space<vmem>>, %arg1: memref<1x11xf32, #tpu.memory_space<vmem>>, %arg2: memref<8x1xf32, #tpu.memory_space<vmem>>) attributes {dimension_semantics = [], scalar_prefetch = 0 : i64, scratch_operands = 0 : i64, tpu.core_type = #tpu.core_type<tc>} {
    %c0 = arith.constant 0 : index
    %c0_0 = arith.constant 0 : index
    %0 = vector.load %arg0[%c0, %c0_0] : memref<8x10xf32, #tpu.memory_space<vmem>>, vector<8x10xf32>
    %c0_1 = arith.constant 0 : index
    %c0_2 = arith.constant 0 : index
    %1 = vector.load %arg1[%c0_1, %c0_2] : memref<1x11xf32, #tpu.memory_space<vmem>>, vector<1x11xf32>
    %2 = vector.extract_strided_slice %1 {offsets = [0, 0], sizes = [1, 10], strides = [1, 1]} : vector<1x11xf32> to vector<1x10xf32>
    %3 = vector.extract_strided_slice %1 {offsets = [0, 10], sizes = [1, 1], strides = [1, 1]} : vector<1x11xf32> to vector<1x1xf32>
    %4 = vector.broadcast %2 : vector<1x10xf32> to vector<8x10xf32>
    %5 = arith.mulf %0, %4 : vector<8x10xf32>
    %cst = arith.constant dense<0.000000e+00> : vector<8xf32>
    %6 = vector.multi_reduction <add>, %5, %cst [1] : vector<8x10xf32> to vector<8xf32>
    %7 = vector.shape_cast %6 : vector<8xf32> to vector<8x1xf32>
    %8 = vector.broadcast %3 : vector<1x1xf32> to vector<8x1xf32>
    %9 = arith.addf %7, %8 : vector<8x1xf32>
    %c0_3 = arith.constant 0 : index
    %c0_4 = arith.constant 0 : index
    %10 = vector.load %arg2[%c0_3, %c0_4] : memref<8x1xf32, #tpu.memory_space<vmem>>, vector<8x1xf32>
    tpu.vector_store %arg2[%c0_3, %c0_4], %9 {strides = array<i32>} : memref<8x1xf32, #tpu.memory_space<vmem>>, vector<8x1xf32>,
    return
  }
}

</mosaic_0001>

<bundles_post_ra>
// kernel: tpu_custom_call.1
= control target key start
LH: loop header
LB: loop body
LE: loop exit
PB: predicated region body
PF: predicated region fallthrough
CT: control target
= control target key end

     0   :  { %7 = vsyncpa [#allocation3], 0  ;;  %s145_s0 = inlined_call_operand.hbm [shape: f32[8,10], index: 0, kind: input, shape index: {}]   ;;  %s146_s1 = inlined_call_operand.hbm [shape: f32[1,11], index: 1, kind: input, shape index: {}]   ;;  %s147_s2 = inlined_call_operand.vmem [shape: f32[8,1], index: 2, kind: output, shape index: {}]  }
   0x1   :  { %s14_s11 = sshll.u32 %s145_s0, 4  ;;  %s15_s11 = int_to_ptr.hbm [resolvable:$true] %s14_s11 }
   0x2   :  { %8 = vsyncpa [#allocation5], 0  ;;  %s118_s12 = smov [#allocation2]   ;;  %s25_s16 = sshll.u32 %s146_s1, 4  ;;  %s26_s16 = int_to_ptr.hbm [resolvable:$true] %s25_s16 }
   0x3   :  { %s16_s13 = sshll.u32 %s118_s12, 4  ;;  %s119_s17 = smov [#allocation4]   ;;  %s17_s13 = int_to_ptr.vmem [resolvable:$true] %s16_s13 }
   0x4   :  { %19 = dma.hbm_to_vmem [thread:$0]  %s15_s11, 128, %s17_s13, [#allocation3]  }
   0x5   :  { %s27_s18 = sshll.u32 %s119_s17, 4  ;;  %s28_s18 = int_to_ptr.vmem [resolvable:$true] %s27_s18 }
   0x6   :  { %30 = dma.hbm_to_vmem [thread:$0]  %s26_s16, 16, %s28_s18, [#allocation5]  }
   0x7   :  { %114 = dma.done.wait [#allocation3], 128  }
   0x8   :  { %115 = vsyncadd [#allocation3], 4294967168 }
   0x9   :  { %116 = dma.done.wait [#allocation5], 16  }
   0xa   :  { %117 = vsyncadd [#allocation5], 4294967280  ;;  %v39_v0 = vld [vmem:[#allocation2] sm:$0xff]  ;;  %v65_v1 = vld [vmem:[#allocation4] ss:$0 sm:$0xff]  ;;  %vm45_vm0 = vcmask 80896  }
   0xb   :  { %v44_v2 = vmul.f32 %v65_v1, %v39_v0  ;;  %s120_s0 = smov 118   ;;  %vm54_vm1 = vcmask 7168  }
   0xd   :  { %v46_v3 = vsel %vm45_vm0, %v44_v2, 0.0 }
   0xe   :  { %47 = vadd.xlane.f32.xlu0 %v46_v3 }
  0x81   :  { %v48_v4 = vpop.xlane.xlu0 %47 }
  0x82   :  { %v49_v5 = vadd.f32 %v65_v1, %v48_v4 }
  0x84   :  { %51 = vrot.lane.b32.xlu0 %v49_v5, %s120_s0 }
  0xf6   :  { %v52_v6 = vpop.permute.xlu0 %51 }
  0xf7   :  { %55 = vst.msk [vmem:[%s147_s2] sm:$0xff] %vm54_vm1, %v52_v6 }
  0xf8   :  { %60 = vsyncpa [#allocation3], 1 }
  0xf9   :  { %61 = vsyncpa [#allocation5], 1 }

</bundles_post_ra>
